<compile_context>
chip_gen: v6e
topology: v6e:2x2x1
jax: 0.10.0
libtpu: 0.0.40
codegen_flags: <defaults>
</compile_context>

<pallas_src>
import math

import jax
import jax.numpy as jnp
from jax import lax
from jax.experimental import pallas as pl
from jax.experimental.pallas import tpu as pltpu


def make_gaussian_1d(kernel_size=21, sigma=3.0):
    """1D Gaussian exactly as the PyTorch __init__ builds it per dim,
    normalized so that outer(g, g) equals kernel2d / sum(kernel2d)."""
    ax = jnp.arange(kernel_size, dtype=jnp.float32)
    mean = (kernel_size - 1) / 2.0
    # NOTE: torch code uses exp(-((x - mean) / (2*std))**2) -- reproduced verbatim.
    g = (1.0 / (sigma * math.sqrt(2.0 * math.pi))) * jnp.exp(
        -(((ax - mean) / (2.0 * sigma)) ** 2)
    )
    return (g / jnp.sum(g)).astype(jnp.float32)


def make_gaussian_weight(channels=3, kernel_size=21, sigma=3.0, dtype=jnp.float32):
    """(C, 1, K, K) depthwise weight identical to the PyTorch module's buffer
    (used only for the XLA reference check)."""
    ax = jnp.arange(kernel_size, dtype=jnp.float32)
    mean = (kernel_size - 1) / 2.0
    g1 = (1.0 / (sigma * math.sqrt(2.0 * math.pi))) * jnp.exp(
        -(((ax - mean) / (2.0 * sigma)) ** 2)
    )
    k2 = jnp.outer(g1, g1)
    k2 = k2 / jnp.sum(k2)
    w = jnp.broadcast_to(k2[None, None], (channels, 1, kernel_size, kernel_size))
    return w.astype(dtype)


def _toeplitz_valid(g, n_in, n_out):
    """T of shape (n_out, n_in) with T[r, r+i] = g[i], so T @ x is the VALID
    1D correlation of x with g (matches F.conv2d's cross-correlation)."""
    K = g.shape[0]
    r = jnp.arange(n_out)[:, None]
    c = jnp.arange(n_in)[None, :]
    idx = c - r
    valid = (idx >= 0) & (idx < K)
    return jnp.where(valid, g[jnp.clip(idx, 0, K - 1)], 0.0).astype(jnp.float32)


def _smooth_kernel(x_ref, tv_ref, th_ref, o_ref):
    # x_ref : (B, H, W)   B images packed per grid step
    # tv_ref: (Ho, H)     vertical Toeplitz  (VMEM-resident across grid)
    # th_ref: (W, Wo)     horizontal Toeplitz (VMEM-resident across grid)
    # o_ref : (B, Ho, Wo)
    x = x_ref[...].astype(jnp.float32)                  # cast once per tile
    tv = tv_ref[...]
    th = th_ref[...]
    B = x.shape[0]
    tv_b = jnp.broadcast_to(tv[None], (B,) + tv.shape)  # hoisted, tiny
    th_b = jnp.broadcast_to(th[None], (B,) + th.shape)
    # Horizontal pass then vertical pass, both batched matmuls on the MXU.
    y = jnp.einsum('bhw,bwo->bho', x, th_b, preferred_element_type=jnp.float32)
    out = jnp.einsum('bvh,bho->bvo', tv_b, y, preferred_element_type=jnp.float32)
    o_ref[...] = out.astype(o_ref.dtype)


def gaussian_smoothing(x, g1d, *, block_b=4):
    """Depthwise valid 2D Gaussian smoothing.

    x   : (N, C, H, W)
    g1d : (K,) normalized separable Gaussian (same for every channel).
    Returns (N, C, H-K+1, W-K+1) == F.conv2d(x, weight, groups=C).
    """
    N, C, H, W = x.shape
    K = int(g1d.shape[0])
    assert H >= K and W >= K, "spatial dims must be >= kernel_size for valid conv"
    Ho, Wo = H - K + 1, W - K + 1

    tv = _toeplitz_valid(g1d, H, Ho)        # (Ho, H)
    th = _toeplitz_valid(g1d, W, Wo).T      # (W, Wo)

    NC = N * C
    B = max(1, min(block_b, NC))
    n_steps = (NC + B - 1) // B
    NCp = n_steps * B

    xf = x.reshape(NC, H, W)
    if NCp != NC:
        xf = jnp.pad(xf, ((0, NCp - NC), (0, 0), (0, 0)))

    out = pl.pallas_call(
        _smooth_kernel,
        out_shape=jax.ShapeDtypeStruct((NCp, Ho, Wo), x.dtype),
        grid_spec=pltpu.PrefetchScalarGridSpec(
            num_scalar_prefetch=0,
            grid=(n_steps,),
            in_specs=[
                pl.BlockSpec((B, H, W), lambda i: (i, 0, 0)),
                pl.BlockSpec((Ho, H), lambda i: (0, 0)),   # constant -> resident
                pl.BlockSpec((W, Wo), lambda i: (0, 0)),   # constant -> resident
            ],
            out_specs=pl.BlockSpec((B, Ho, Wo), lambda i: (i, 0, 0)),
        ),
        compiler_params=pltpu.CompilerParams(
            dimension_semantics=("parallel",),
        ),
    )(xf, tv, th)

    return out[:NC].reshape(N, C, Ho, Wo)


if __name__ == "__main__":
    # Module defaults: channels=3, kernel_size=21, sigma=3, dim=2.
    channels, kernel_size, sigma = 3, 21, 3.0
    N, H, W = 2, 32, 32   # spatial must be >= kernel_size (valid conv)

    key = jax.random.PRNGKey(0)
    x = jax.random.normal(key, (N, channels, H, W), dtype=jnp.float32)

    g1d = make_gaussian_1d(kernel_size, sigma)
    out = gaussian_smoothing(x, g1d)
    out = jax.block_until_ready(out)

    # Reference check against XLA's grouped conv (same semantics as
    # F.conv2d(x, weight, groups=C) with the module's (C,1,K,K) buffer).
    weight = make_gaussian_weight(channels, kernel_size, sigma)
    ref = lax.conv_general_dilated(
        x, weight,
        window_strides=(1, 1),
        padding="VALID",
        dimension_numbers=("NCHW", "OIHW", "NCHW"),
        feature_group_count=channels,
    )
    assert out.shape == (N, channels, H - kernel_size + 1, W - kernel_size + 1)
    assert jnp.allclose(out, ref, atol=1e-5, rtol=1e-5), "mismatch vs XLA reference"

    print("KERNEL_OK")
</pallas_src>

<mosaic_0001>
module attributes {stable_mosaic.version = 11 : i64} {
  func.func @_smooth_kernel(%arg0: i32, %arg1: memref<4x32x32xf32, #tpu.memory_space<vmem>>, %arg2: memref<12x32xf32, #tpu.memory_space<vmem>>, %arg3: memref<32x12xf32, #tpu.memory_space<vmem>>, %arg4: memref<4x12x12xf32, #tpu.memory_space<vmem>>) attributes {dimension_semantics = [#tpu.dimension_semantics<parallel>], iteration_bounds = array<i64: 2>, scalar_prefetch = 0 : i64, scratch_operands = 0 : i64, tpu.core_type = #tpu.core_type<tc>, window_params = [{transform_indices = @transform_0, window_bounds = array<i64: 4, 32, 32>}, {pipeline_mode = #tpu.pipeline_mode<synchronous>, transform_indices = @transform_1, window_bounds = array<i64: 12, 32>}, {pipeline_mode = #tpu.pipeline_mode<synchronous>, transform_indices = @transform_2, window_bounds = array<i64: 32, 12>}, {transform_indices = @transform_3, window_bounds = array<i64: 4, 12, 12>}]} {
    %c0 = arith.constant 0 : index
    %c0_0 = arith.constant 0 : index
    %c0_1 = arith.constant 0 : index
    %0 = vector.load %arg1[%c0, %c0_0, %c0_1] : memref<4x32x32xf32, #tpu.memory_space<vmem>>, vector<4x32x32xf32>
    %c0_2 = arith.constant 0 : index
    %c0_3 = arith.constant 0 : index
    %1 = vector.load %arg2[%c0_2, %c0_3] : memref<12x32xf32, #tpu.memory_space<vmem>>, vector<12x32xf32>
    %c0_4 = arith.constant 0 : index
    %c0_5 = arith.constant 0 : index
    %2 = vector.load %arg3[%c0_4, %c0_5] : memref<32x12xf32, #tpu.memory_space<vmem>>, vector<32x12xf32>
    %3 = vector.shape_cast %1 : vector<12x32xf32> to vector<1x12x32xf32>
    %4 = vector.shape_cast %3 : vector<1x12x32xf32> to vector<1x12x32xf32>
    %5 = vector.broadcast %4 : vector<1x12x32xf32> to vector<4x12x32xf32>
    %6 = vector.shape_cast %2 : vector<32x12xf32> to vector<1x32x12xf32>
    %7 = vector.shape_cast %6 : vector<1x32x12xf32> to vector<1x32x12xf32>
    %8 = vector.broadcast %7 : vector<1x32x12xf32> to vector<4x32x12xf32>
    "tpu.trace_start"() <{level = 10 : i32, message = "bhw,bwo->bho"}> : () -> ()
    %cst = arith.constant dense<0.000000e+00> : vector<4x32x12xf32>
    %9 = tpu.matmul %0, %8, %cst {dimension_numbers = #tpu.dot_dimension_numbers<[2], [1], [1], [2], [0, 0, 0, 1, 1, 2], [0], [0]>} : vector<4x32x32xf32>, vector<4x32x12xf32>, vector<4x32x12xf32> -> vector<4x32x12xf32>
    "tpu.trace_stop"() : () -> ()
    "tpu.trace_start"() <{level = 10 : i32, message = "bvh,bho->bvo"}> : () -> ()
    %cst_6 = arith.constant dense<0.000000e+00> : vector<4x12x12xf32>
    %10 = tpu.matmul %5, %9, %cst_6 {dimension_numbers = #tpu.dot_dimension_numbers<[2], [1], [1], [2], [0, 0, 0, 1, 1, 2], [0], [0]>} : vector<4x12x32xf32>, vector<4x32x12xf32>, vector<4x12x12xf32> -> vector<4x12x12xf32>
    "tpu.trace_stop"() : () -> ()
    %c0_7 = arith.constant 0 : index
    %c0_8 = arith.constant 0 : index
    %c0_9 = arith.constant 0 : index
    %11 = vector.load %arg4[%c0_7, %c0_8, %c0_9] : memref<4x12x12xf32, #tpu.memory_space<vmem>>, vector<4x12x12xf32>
    tpu.vector_store %arg4[%c0_7, %c0_8, %c0_9], %10 {strides = array<i32>} : memref<4x12x12xf32, #tpu.memory_space<vmem>>, vector<4x12x12xf32>,
    return
  }
  func.func @transform_0(%arg0: i32) -> (i32, i32, i32) {
    %c0_i32 = arith.constant 0 : i32
    %c0_i32_0 = arith.constant 0 : i32
    %c0_i32_1 = arith.constant 0 : i32
    return %arg0, %c0_i32, %c0_i32_0 : i32, i32, i32
  }
  func.func @transform_1(%arg0: i32) -> (i32, i32) {
    %c0_i32 = arith.constant 0 : i32
    %c0_i32_0 = arith.constant 0 : i32
    %c0_i32_1 = arith.constant 0 : i32
    return %c0_i32, %c0_i32_0 : i32, i32
  }
  func.func @transform_2(%arg0: i32) -> (i32, i32) {
    %c0_i32 = arith.constant 0 : i32
    %c0_i32_0 = arith.constant 0 : i32
    %c0_i32_1 = arith.constant 0 : i32
    return %c0_i32, %c0_i32_0 : i32, i32
  }
  func.func @transform_3(%arg0: i32) -> (i32, i32, i32) {
    %c0_i32 = arith.constant 0 : i32
    %c0_i32_0 = arith.constant 0 : i32
    %c0_i32_1 = arith.constant 0 : i32
    return %arg0, %c0_i32, %c0_i32_0 : i32, i32, i32
  }
}

</mosaic_0001>

<bundles_post_ra>
// kernel: tpu_custom_call.1
= control target key start
LH: loop header
LB: loop body
LE: loop exit
PB: predicated region body
PF: predicated region fallthrough
CT: control target
= control target key end

     0   :  { %8 = vsyncpa [#allocation3], 0  ;;  %s1478_s0 = inlined_call_operand.hbm [shape: f32[8,32,32], index: 0, kind: input, shape index: {}]   ;;  %s1479_s1 = inlined_call_operand.vmem [shape: f32[12,32], index: 1, kind: input, shape index: {}]   ;;  %s1480_s2 = inlined_call_operand.vmem [shape: f32[32,12], index: 2, kind: input, shape index: {}]   ;;  %s1481_s3 = inlined_call_operand.vmem [shape: f32[8,12,12], index: 3, kind: output, shape index: {}]  }
   0x1   :  { %10 = vsyncpa [#allocation3 + $0x1], 0  ;;  %s1318_s12 = smov 0   ;;  %s1320_s13 = smov 0  }
   0x2   :  { %s1322_s14 = smov 0   ;;  %s1324_s15 = smov 0  }
   0x3 LB: > { %s992_s16 = sadd.s32 4294967295, %s1293_s15   ;;  %s1338_s17 = sadd.s32 1, %s1293_s15   ;;  %s1293_s15 = sphi %s1324_s15, %s1490_s15   ;;  %s1289_s14 = sphi %s1322_s14, %s1489_s14   ;;  %s1285_s13 = sphi %s1320_s13, %s1488_s13   ;;  %s1281_s12 = sphi %s1318_s12, %s1487_s12  }
   0x4   : > { %s20_s18 = ssub.s32 %s1293_s15, %s1338_s17  ;;  %s23_s19 = sadd.s32 1, %s1289_s14 }
   0x5   : > { %p21_p0 = scmp.eq.s32.totalorder %s20_s18, 0  ;;  %p30_p1 = scmp.ne.s32.totalorder %s1289_s14, %s1285_s13 }
   0x6   : > { %p31_p2 = scmp.eq.s32.totalorder %s1293_s15, 0  ;;  %p36_p3 = scmp.ne.s32.totalorder %s1285_s13, %s1281_s12 }
   0x7   : > { %s1348_s20 = scalar_select %p21_p0, %s1289_s14, %s23_s19  }
   0x8   : > { %p32_p4 = por %p31_p2, %p30_p1  ;;  %p37_p5 = scmp.eq.s32.totalorder %s992_s16, 0 }
   0x9   : > { %p1196_p6 = scmp.lt.s32.totalorder %s1293_s15, 2  ;;  %s134_s22 = sand.u32 1, %s1289_s14  }
   0xa   : > { %p1353_p7 = por %p37_p5, %p36_p3  ;;  %s996_s23 = sshll.u32 %s134_s22, 7 }
   0xb   : > { %s1032_s24 = sshll.u32 %s1293_s15, 11  ;;  %s138_s28 = scalar_lea.vmem [#allocation2], %s996_s23 }
   0xc   : > { %s1483_s21 = scalar_select %p1353_p7, 1, 0 }
   0xd   : > { %s1362_s27 = scalar_lea.hbm %s1478_s0, %s1032_s24  ;;  %s146_s29 = sshll.u32 %s138_s28, 4  ;;  %s1364_s29 = int_to_ptr.vmem [resolvable:$true] %s146_s29 }
   0xe   : > { %p1366_p8 = pnand %p1196_p6, %p32_p4  ;;  %s1371_s4 = scalar_lea.sflag [#allocation3], %s134_s22 }
   0xf   : > { %s1231_s5 = scalar_lea.hbm %s1362_s27, 2048  ;;  %s1236_s8 = scalar_lea.hbm %s1478_s0, 4096 }
  0x10   : > { %p1232_p10 = scmp.ne.s32.totalorder %s1362_s27, %s1231_s5  ;;  %p1233_p11 = pneg %p1366_p8 }
  0x11   : > { %p1237_p0 = scmp.lt.s32.totalorder %s1362_s27, %s1478_s0  ;;  %p1238_p1 = scmp.lt.s32.totalorder %s1236_s8, %s1231_s5 }
  0x12   : > { %p1234_p12 = pnand %p1233_p11, %p1232_p10 }
  0x13   : > { %p1239_p2 = por %p1238_p1, %p1237_p0 }
  0x14   : > { %p1235_p13 = pneg %p1234_p12 }
  0x16   : > { %p1240_p3 = pnand %p1239_p2, %p1235_p13 }
  0x18   : > { %1243 = shalt.err (!%p1240_p3)
}
  0x19   : > { %s1244_s11 = scalar_lea.vmem %s1364_s29, 2048  ;;  %s1295_s12 = smov [#allocation2]  }
  0x1a   : > { %p1245_p4 = scmp.ne.s32.totalorder %s1364_s29, %s1244_s11  ;;  %s1249_s18 = sshll.u32 %s1295_s12, 4  ;;  %s1250_s18 = int_to_ptr.vmem [resolvable:$false] %s1249_s18 }
  0x1b   : > { %s1251_s19 = scalar_lea.vmem %s1250_s18, 4096  ;;  %p1252_p10 = scmp.lt.s32.totalorder %s1364_s29, %s1250_s18 }
  0x1c   : > { %p1247_p5 = pnand %p1245_p4, %p1233_p11  ;;  %p1253_p12 = scmp.lt.s32.totalorder %s1251_s19, %s1244_s11 }
  0x1e   : > { %p1248_p6 = pneg %p1247_p5  ;;  %p1254_p9 = por %p1253_p12, %p1252_p10 }
  0x20   : > { %p1255_p7 = pnand %p1254_p9, %p1248_p6 }
  0x22   : > { %1258 = shalt.err (!%p1255_p7)
}
  0x23   : > { %s1296_s22 = smov 128   ;;  %s1297_s23 = smov 8  }
  0x24   : > { %1195 = dma.hbm_to_vmem [thread:$0]  (!%p1366_p8), %s1362_s27, 2048, %s1364_s29, %s1371_s4, %s1296_s22, %s1296_s22, %s1297_s23  }
  0x25   : > { %p154_p11 = scmp.lt.s32.totalorder %s1293_s15, 3  ;;  %p1485_p13 = scmp.ge.s32.totalorder %s1293_s15, 1 }
  0x27   : > { %p155_p0 = pnand %p1485_p13, %p154_p11 }
  0x28   : > { %s160_s24 = sand.u32 (!%p155_p0), 1, %s1285_s13   ;;  %p1486_p7 = scmp.ne.s32.totalorder (!%p155_p0), %s1483_s21, 0 }
  0x29   : > { %158 = sbr.rel (%p155_p0) target bundleno = 470 (0x1d6), region = 32  ;;  %s1001_s25 = sshll.u32 (!%p155_p0), %s160_s24, 7 }
  0x2a   : > { %s161_s26 = scalar_lea.sflag (!%p155_p0), [#allocation3], %s160_s24  ;;  %s1396_s28 = scalar_lea.vmem (!%p155_p0), [#allocation2], %s1001_s25 }
  0x2e   : > { %1276 = dma.done.wait (%p1486_p7), %s161_s26, 2048  }
  0x2f   : > { %1278 = vsyncadd (%p1486_p7), %s161_s26, 4294965248  ;;  %v217_v0 = vld [vmem:[%s1480_s2 + $0x18] sm:$0xff]  ;;  %v216_v1 = vld [vmem:[%s1480_s2 + $0x10] sm:$0xff]  ;;  %vm218_vm0 = vcmask 261120   ;;  %s1002_s12 = sshll.u32 %s992_s16, 2  ;;  %vm915_vm1 = vcmask 93184  }
  0x30   : > { %1090 = vmatprep.subr.mxu0 %v217_v0  ;;  %1104 = vmatprep.subr.mxu1 %v217_v0  ;;  %v215_v2 = vld [vmem:[%s1480_s2 + $0x8] sm:$0xff]  ;;  %v214_v3 = vld [vmem:[%s1480_s2] sm:$0xff]  ;;  %v198_v8 = vld [vmem:[%s1396_s28 + $0x10] sm:$0xff]  ;;  %p190_p8 = scmp.lt.s32.totalorder %s1002_s12, 7  ;;  %vm913_vm2 = vcmask 97280  }
  0x31   : > { %1091 = vmatpush3.msra.mxu0 %v217_v0  ;;  %1105 = vmatpush3.msra.mxu1 %v217_v0  ;;  %v196_v4 = vld [vmem:[%s1396_s28] sm:$0xff]  ;;  %v197_v6 = vld [vmem:[%s1396_s28 + $0x8] sm:$0xff]  ;;  %v202_v9 = vld [vmem:[%s1396_s28 + $0x30] sm:$0xff] }
  0x32   : > { %1092 = vmatprep.subr.mxu0 %v216_v1  ;;  %1106 = vmatprep.subr.mxu1 %v216_v1  ;;  %v200_v5 = vld [vmem:[%s1396_s28 + $0x20] sm:$0xff]  ;;  %v201_v7 = vld [vmem:[%s1396_s28 + $0x28] sm:$0xff]  ;;  %v199_v10 = vld [vmem:[%s1396_s28 + $0x18] sm:$0xff]  ;;  %s1492_s12 = smov (!%p190_p8, %s1002_s12), 7 }
  0x33   : > { %1093 = vmatpush3.msra.mxu0 %v216_v1  ;;  %1107 = vmatpush3.msra.mxu1 %v216_v1  ;;  %v203_v11 = vld [vmem:[%s1396_s28 + $0x38] sm:$0xff]  ;;  %v204_v12 = vld [vmem:[%s1396_s28 + $0x40] sm:$0xff]  ;;  %v205_v14 = vld [vmem:[%s1396_s28 + $0x48] sm:$0xff]  ;;  %s1033_s18 = sshll.u32 %s1492_s12, 4 }
  0x34   : > { %1094 = vmatprep.subr.mxu0 %v215_v2  ;;  %1108 = vmatprep.subr.mxu1 %v215_v2  ;;  %v208_v13 = vld [vmem:[%s1396_s28 + $0x60] sm:$0xff]  ;;  %v209_v15 = vld [vmem:[%s1396_s28 + $0x68] sm:$0xff]  ;;  %v206_v16 = vld [vmem:[%s1396_s28 + $0x50] sm:$0xff]  ;;  %s194_s23 = scalar_lea.vmem %s1481_s3, %s1033_s18 }
  0x35   : > { %1095 = vmatpush3.msra.mxu0 %v215_v2  ;;  %1109 = vmatpush3.msra.mxu1 %v215_v2  ;;  %v210_v17 = vld [vmem:[%s1396_s28 + $0x70] sm:$0xff]  ;;  %v207_v18 = vld [vmem:[%s1396_s28 + $0x58] sm:$0xff]  ;;  %v212_v20 = vld [vmem:[%s1479_s1] sm:$0xff] }
  0x36   : > { %1096 = vmatprep.subr.mxu0 %v214_v3  ;;  %1110 = vmatprep.subr.mxu1 %v214_v3  ;;  %v211_v19 = vld [vmem:[%s1396_s28 + $0x78] sm:$0xff]  ;;  %v213_v31 = vld [vmem:[%s1479_s1 + $0x8] sm:$0xf] }
  0x37   : > { %1097 = vmatpush3.msra.mxu0 %v214_v3  ;;  %1098 = vmatprep.mubr.msk.f32.mxu0 %vm218_vm0, %v196_v4 }
  0x38   : > { %1111 = vmatpush3.msra.mxu1 %v214_v3  ;;  %1112 = vmatprep.mubr.msk.f32.mxu1 %vm218_vm0, %v200_v5 }
  0x39   : > { %1099 = vmatmul.mubr.msk.f32.vlgmr.msra.gmra.mxu0 %vm218_vm0, %v197_v6  ;;  %1113 = vmatmul.mubr.msk.f32.vlgmr.msra.gmra.mxu1 %vm218_vm0, %v201_v7 }
  0x3a   : > { %1118 = vmatprep.subr.mxu0 %v217_v0  ;;  %1132 = vmatprep.subr.mxu1 %v217_v0 }
  0x3b   : > { %1119 = vmatpush3.msra.mxu0 %v217_v0  ;;  %1133 = vmatpush3.msra.mxu1 %v217_v0 }
  0x3c   : > { %1120 = vmatprep.subr.mxu0 %v216_v1  ;;  %1134 = vmatprep.subr.mxu1 %v216_v1 }
  0x3d   : > { %1101 = vmatprep.mubr.msk.f32.mxu0 %vm218_vm0, %v198_v8  ;;  %1115 = vmatprep.mubr.msk.f32.mxu1 %vm218_vm0, %v202_v9 }
  0x3e   : > { %1121 = vmatpush3.msra.mxu0 %v216_v1  ;;  %1135 = vmatpush3.msra.mxu1 %v216_v1 }
  0x3f   : > { %1102 = vmatmul.mubr.msk.f32.gmra.mxu0 %vm218_vm0, %v199_v10  ;;  %1116 = vmatmul.mubr.msk.f32.gmra.mxu1 %vm218_vm0, %v203_v11 }
  0x40   : > { %1122 = vmatprep.subr.mxu0 %v215_v2  ;;  %1136 = vmatprep.subr.mxu1 %v215_v2 }
  0x41   : > { %1123 = vmatpush3.msra.mxu0 %v215_v2  ;;  %1137 = vmatpush3.msra.mxu1 %v215_v2 }
  0x42   : > { %1124 = vmatprep.subr.mxu0 %v214_v3  ;;  %1138 = vmatprep.subr.mxu1 %v214_v3 }
  0x43   : > { %1125 = vmatpush3.msra.mxu0 %v214_v3  ;;  %1126 = vmatprep.mubr.msk.f32.mxu0 %vm218_vm0, %v204_v12 }
  0x44   : > { %1139 = vmatpush3.msra.mxu1 %v214_v3  ;;  %1140 = vmatprep.mubr.msk.f32.mxu1 %vm218_vm0, %v208_v13 }
  0x45   : > { %1127 = vmatmul.mubr.msk.f32.vlgmr.msra.gmra.mxu0 %vm218_vm0, %v205_v14  ;;  %1141 = vmatmul.mubr.msk.f32.vlgmr.msra.gmra.mxu1 %vm218_vm0, %v209_v15 }
  0x46   : > { %1129 = vmatprep.mubr.msk.f32.mxu0 %vm218_vm0, %v206_v16  ;;  %1143 = vmatprep.mubr.msk.f32.mxu1 %vm218_vm0, %v210_v17 }
  0x49   : > { %1130 = vmatmul.mubr.msk.f32.gmra.mxu0 %vm218_vm0, %v207_v18  ;;  %1144 = vmatmul.mubr.msk.f32.gmra.mxu1 %vm218_vm0, %v211_v19 }
  0x4a   : > { %1154 = vmatprep.mubr.msk.f32.mxu0 %vm218_vm0, %v212_v20  ;;  %1165 = vmatprep.mubr.msk.f32.mxu1 %vm218_vm0, %v212_v20 }
  0xf9   : > { %v1100_v21 = vpop.f32.mrf.mxu0  ;;  %v1114_v22 = vpop.f32.mrf.mxu1 }
  0xfb   : > { %v297_v23 = vpop.f32.mrf.mxu0  ;;  %v394_v24 = vpop.f32.mrf.mxu1 }
  0xff   : > { %v1103_v25 = vpop.f32.mrf.mxu0  ;;  %v1117_v26 = vpop.f32.mrf.mxu1 }
 0x100   : > { %1146 = vmatprep.subr.mxu0 %v1103_v25  ;;  %1157 = vmatprep.subr.mxu1 %v1117_v26 }
 0x101   : > { %v307_v27 = vpop.f32.mrf.mxu0  ;;  %v404_v28 = vpop.f32.mrf.mxu1  ;;  %1147 = vmatpush3.msra.mxu0 %v1103_v25  ;;  %1158 = vmatpush3.msra.mxu1 %v1117_v26 }
 0x102   : > { %1148 = vmatprep.subr.mxu0 %v307_v27  ;;  %1159 = vmatprep.subr.mxu1 %v404_v28 }
 0x103   : > { %1149 = vmatpush3.msra.mxu0 %v307_v27  ;;  %1160 = vmatpush3.msra.mxu1 %v404_v28 }
 0x104   : > { %1150 = vmatprep.subr.mxu0 %v1100_v21  ;;  %1161 = vmatprep.subr.mxu1 %v1114_v22 }
 0x105   : > { %v1128_v29 = vpop.f32.mrf.mxu0  ;;  %v1142_v30 = vpop.f32.mrf.mxu1  ;;  %1151 = vmatpush3.msra.mxu0 %v1100_v21  ;;  %1162 = vmatpush3.msra.mxu1 %v1114_v22 }
 0x106   : > { %1152 = vmatprep.subr.mxu0 %v297_v23  ;;  %1163 = vmatprep.subr.mxu1 %v394_v24 }
 0x107   : > { %v491_v32 = vpop.f32.mrf.mxu0  ;;  %v588_v33 = vpop.f32.mrf.mxu1  ;;  %1153 = vmatpush3.msra.mxu0 %v297_v23  ;;  %1164 = vmatpush3.msra.mxu1 %v394_v24 }
 0x108   : > { %1155 = vmatmul.mubr.msk.f32.vlgmr.msra.gmra.mxu0 %vm218_vm0, %v213_v31  ;;  %1166 = vmatmul.mubr.msk.f32.vlgmr.msra.gmra.mxu1 %vm218_vm0, %v213_v31 }
 0x109   : > { %v1131_v34 = vpop.f32.mrf.mxu0  ;;  %v1145_v35 = vpop.f32.mrf.mxu1  ;;  %1176 = vmatprep.mubr.msk.f32.mxu0 %vm218_vm0, %v212_v20  ;;  %1187 = vmatprep.mubr.msk.f32.mxu1 %vm218_vm0, %v212_v20 }
 0x10a   : > { %1168 = vmatprep.subr.mxu0 %v1131_v34  ;;  %1179 = vmatprep.subr.mxu1 %v1145_v35 }
 0x10b   : > { %v501_v36 = vpop.f32.mrf.mxu0  ;;  %v598_v37 = vpop.f32.mrf.mxu1  ;;  %1169 = vmatpush3.msra.mxu0 %v1131_v34  ;;  %1180 = vmatpush3.msra.mxu1 %v1145_v35 }
 0x10c   : > { %1170 = vmatprep.subr.mxu0 %v501_v36  ;;  %1181 = vmatprep.subr.mxu1 %v598_v37 }
 0x10d   : > { %1171 = vmatpush3.msra.mxu0 %v501_v36  ;;  %1182 = vmatpush3.msra.mxu1 %v598_v37 }
 0x10e   : > { %1172 = vmatprep.subr.mxu0 %v1128_v29  ;;  %1183 = vmatprep.subr.mxu1 %v1142_v30 }
 0x10f   : > { %1173 = vmatpush3.msra.mxu0 %v1128_v29  ;;  %1184 = vmatpush3.msra.mxu1 %v1142_v30 }
 0x110   : > { %1174 = vmatprep.subr.mxu0 %v491_v32  ;;  %1185 = vmatprep.subr.mxu1 %v588_v33 }
 0x111   : > { %1175 = vmatpush3.msra.mxu0 %v491_v32  ;;  %1186 = vmatpush3.msra.mxu1 %v588_v33 }
 0x112   : > { %1177 = vmatmul.mubr.msk.f32.vlgmr.msra.gmra.mxu0 %vm218_vm0, %v213_v31  ;;  %1188 = vmatmul.mubr.msk.f32.vlgmr.msra.gmra.mxu1 %vm218_vm0, %v213_v31 }
 0x1c8   : > { %v1156_v38 = vpop.f32.mrf.mxu0  ;;  %v1167_v39 = vpop.f32.mrf.mxu1 }
 0x1c9   : > { %916 = vst.msk [vmem:[%s194_s23 + $0x8] sm:$0xf] %vm915_vm1, %v1156_v38  ;;  %918 = vst.msk [vmem:[%s194_s23 + $0x18] sm:$0xf] %vm915_vm1, %v1167_v39 }
 0x1ca   : > { %v679_v40 = vpop.f32.mrf.mxu0  ;;  %v754_v41 = vpop.f32.mrf.mxu1 }
 0x1cb   : > { %914 = vst.msk [vmem:[%s194_s23] sm:$0xff] %vm913_vm2, %v679_v40  ;;  %917 = vst.msk [vmem:[%s194_s23 + $0x10] sm:$0xff] %vm913_vm2, %v754_v41 }
 0x1d2   : > { %v1178_v42 = vpop.f32.mrf.mxu0  ;;  %v1189_v43 = vpop.f32.mrf.mxu1 }
 0x1d3   : > { %920 = vst.msk [vmem:[%s194_s23 + $0x28] sm:$0xf] %vm915_vm1, %v1178_v42  ;;  %922 = vst.msk [vmem:[%s194_s23 + $0x38] sm:$0xf] %vm915_vm1, %v1189_v43 }
 0x1d4   : > { %v829_v44 = vpop.f32.mrf.mxu0  ;;  %v904_v45 = vpop.f32.mrf.mxu1 }
 0x1d5   : > { %919 = vst.msk [vmem:[%s194_s23 + $0x20] sm:$0xff] %vm913_vm2, %v829_v44  ;;  %921 = vst.msk [vmem:[%s194_s23 + $0x30] sm:$0xff] %vm913_vm2, %v904_v45 }
 0x1d6 PF: > { %p13_p9 = scmp.ge.s32.totalorder %s1338_s17, 4   ;;  %s1487_s12 = smov %s1285_s13 }
 0x1d7   : > { %s1488_s13 = smov %s1289_s14  ;;  %s1489_s14 = smov %s1348_s20 }
 0x1d8   : > { %s1490_s15 = smov %s1338_s17  ;;  %15 = sbr.rel (!%p13_p9) target bundleno = 3 (0x3), region = 72 }
 0x1dd   :  { %947 = vsyncpa [#allocation3], 1 }
 0x1de   :  { %949 = vsyncpa [#allocation3 + $0x1], 1 }

</bundles_post_ra>
